<compile_context>
chip_gen: v6e
topology: v6e:2x2x1
jax: 0.10.0
libtpu: 0.0.40
codegen_flags: <defaults>
</compile_context>

<pallas_src>
import functools

import jax
import jax.numpy as jnp
from jax.experimental import pallas as pl
from jax.experimental.pallas import tpu as pltpu


O_PAD = 128  # lane-dense output width; real logits live in the first O columns


def rnn_kernel(x_ref, wih_ref, whh_ref, b_ref, wfc_ref, bfc_ref, out_ref,
               *, seq_len, batch):
    """Whole forward in one invocation.

    x_ref   : (S*B, E) time-major embedded tokens (row = t*B + b)
    wih_ref : (E, H)   input->hidden weight (transposed)
    whh_ref : (H, H)   hidden->hidden weight (transposed)
    b_ref   : (1, H)   b_ih + b_hh
    wfc_ref : (H, 128) fc weight, zero-padded to 128 lanes
    bfc_ref : (1, 128) fc bias, zero-padded to 128 lanes
    out_ref : (B, 128) lane-dense logits (columns >= O are zero)
    """
    # Hoisted, time-independent input projection: one (S*B,E)x(E,H) MXU matmul.
    xproj = (jnp.dot(x_ref[...], wih_ref[...],
                     preferred_element_type=jnp.float32)
             + b_ref[...])                                   # (S*B, H)

    whh = whh_ref[...]                                       # (H, H), load once
    h = jnp.zeros((batch, whh.shape[0]), jnp.float32)

    # Serial recurrence, fully unrolled (S is small & static): exactly one
    # dependent MXU op per step on the critical path.
    for t in range(seq_len):
        x_t = xproj[t * batch:(t + 1) * batch, :]            # (B, H) static slice
        h = jnp.tanh(x_t + jnp.dot(h, whh,
                                   preferred_element_type=jnp.float32))

    # Final linear on the last hidden state; 128-lane output -> unmasked store.
    out_ref[...] = (jnp.dot(h, wfc_ref[...],
                            preferred_element_type=jnp.float32)
                    + bfc_ref[...]).astype(out_ref.dtype)


def rnn_forward(text, params):
    """text: (S, B) int32 token ids.  Returns fc(final hidden): (B, O)."""
    emb_table = params["embedding"]          # (V, E)
    w_ih = params["w_ih"]                    # (H, E)  PyTorch layout
    w_hh = params["w_hh"]                    # (H, H)
    b_ih = params["b_ih"]                    # (H,)
    b_hh = params["b_hh"]                    # (H,)
    w_fc = params["w_fc"]                    # (O, H)
    b_fc = params["b_fc"]                    # (O,)

    embedded = jnp.take(emb_table, text, axis=0)     # (S, B, E) glue gather
    # TODO(synk): fuse the embedding gather into the kernel (scalar-prefetched
    # token ids + Element index_map) once S*B*E is large enough to matter.
    S, B, E = embedded.shape
    H = w_hh.shape[0]
    O = w_fc.shape[0]

    x_flat = embedded.reshape(S * B, E)              # time-major rows: t*B + b
    b_rnn = (b_ih + b_hh).reshape(1, H)

    # Lane-dense fc weights/bias: zero-padded columns -> exact after the slice.
    wfc_pad = jnp.zeros((H, O_PAD), jnp.float32).at[:, :O].set(w_fc.T)
    bfc_pad = jnp.zeros((1, O_PAD), jnp.float32).at[:, :O].set(b_fc.reshape(1, O))

    kernel = functools.partial(rnn_kernel, seq_len=S, batch=B)
    out_pad = pl.pallas_call(
        kernel,
        out_shape=jax.ShapeDtypeStruct((B, O_PAD), jnp.float32),
        grid=(1,),  # single invocation: whole problem resident in VMEM (~20 KB)
        in_specs=[
            pl.BlockSpec((S * B, E), lambda i: (0, 0)),
            pl.BlockSpec((E, H), lambda i: (0, 0)),
            pl.BlockSpec((H, H), lambda i: (0, 0)),
            pl.BlockSpec((1, H), lambda i: (0, 0)),
            pl.BlockSpec((H, O_PAD), lambda i: (0, 0)),
            pl.BlockSpec((1, O_PAD), lambda i: (0, 0)),
        ],
        out_specs=pl.BlockSpec((B, O_PAD), lambda i: (0, 0)),
        compiler_params=pltpu.CompilerParams(
            dimension_semantics=("arbitrary",)),
    )(x_flat, w_ih.T, w_hh.T, b_rnn, wfc_pad, bfc_pad)

    return out_pad[:, :O]


def rnn_forward_ref(text, params):
    """Pure-JAX reference of the PyTorch forward (for a sanity check)."""
    emb = jnp.take(params["embedding"], text, axis=0)   # (S, B, E)

    def step(h, x_t):
        h_new = jnp.tanh(x_t @ params["w_ih"].T + params["b_ih"]
                         + h @ params["w_hh"].T + params["b_hh"])
        return h_new, None

    B = text.shape[1]
    H = params["w_hh"].shape[0]
    h0 = jnp.zeros((B, H), jnp.float32)
    h_final, _ = jax.lax.scan(step, h0, emb)
    return h_final @ params["w_fc"].T + params["b_fc"]


def init_params(key, input_dim, embedding_dim, hidden_dim, output_dim):
    ks = jax.random.split(key, 7)
    k_rnn = 1.0 / jnp.sqrt(hidden_dim)
    k_fc = 1.0 / jnp.sqrt(hidden_dim)
    return {
        "embedding": jax.random.normal(ks[0], (input_dim, embedding_dim),
                                       jnp.float32),
        "w_ih": jax.random.uniform(ks[1], (hidden_dim, embedding_dim),
                                   jnp.float32, -k_rnn, k_rnn),
        "w_hh": jax.random.uniform(ks[2], (hidden_dim, hidden_dim),
                                   jnp.float32, -k_rnn, k_rnn),
        "b_ih": jax.random.uniform(ks[3], (hidden_dim,), jnp.float32,
                                   -k_rnn, k_rnn),
        "b_hh": jax.random.uniform(ks[4], (hidden_dim,), jnp.float32,
                                   -k_rnn, k_rnn),
        "w_fc": jax.random.uniform(ks[5], (output_dim, hidden_dim),
                                   jnp.float32, -k_fc, k_fc),
        "b_fc": jax.random.uniform(ks[6], (output_dim,), jnp.float32,
                                   -k_fc, k_fc),
    }


if __name__ == "__main__":
    INPUT_DIM = 50       # vocab size
    EMBEDDING_DIM = 32
    HIDDEN_DIM = 32
    OUTPUT_DIM = 2
    SEQ_LEN = 8
    BATCH = 4

    key = jax.random.PRNGKey(0)
    k_params, k_text = jax.random.split(key)
    params = init_params(k_params, INPUT_DIM, EMBEDDING_DIM, HIDDEN_DIM,
                         OUTPUT_DIM)
    text = jax.random.randint(k_text, (SEQ_LEN, BATCH), 0, INPUT_DIM,
                              dtype=jnp.int32)

    logits = jax.block_until_ready(rnn_forward(text, params))
    ref = jax.block_until_ready(rnn_forward_ref(text, params))

    assert logits.shape == (BATCH, OUTPUT_DIM)
    assert jnp.allclose(logits, ref, atol=1e-5, rtol=1e-5)
    print("KERNEL_OK")
</pallas_src>

<mosaic_0001>
module attributes {stable_mosaic.version = 11 : i64} {
  func.func @rnn_kernel(%arg0: i32, %arg1: memref<32x32xf32, #tpu.memory_space<vmem>>, %arg2: memref<32x32xf32, #tpu.memory_space<vmem>>, %arg3: memref<32x32xf32, #tpu.memory_space<vmem>>, %arg4: memref<1x32xf32, #tpu.memory_space<vmem>>, %arg5: memref<32x128xf32, #tpu.memory_space<vmem>>, %arg6: memref<1x128xf32, #tpu.memory_space<vmem>>, %arg7: memref<4x128xf32, #tpu.memory_space<vmem>>) attributes {dimension_semantics = [#tpu.dimension_semantics<arbitrary>], iteration_bounds = array<i64: 1>, scalar_prefetch = 0 : i64, scratch_operands = 0 : i64, tpu.core_type = #tpu.core_type<tc>, window_params = [{pipeline_mode = #tpu.pipeline_mode<synchronous>, transform_indices = @transform_0, window_bounds = array<i64: 32, 32>}, {pipeline_mode = #tpu.pipeline_mode<synchronous>, transform_indices = @transform_1, window_bounds = array<i64: 32, 32>}, {pipeline_mode = #tpu.pipeline_mode<synchronous>, transform_indices = @transform_2, window_bounds = array<i64: 32, 32>}, {pipeline_mode = #tpu.pipeline_mode<synchronous>, transform_indices = @transform_3, window_bounds = array<i64: 1, 32>}, {pipeline_mode = #tpu.pipeline_mode<synchronous>, transform_indices = @transform_4, window_bounds = array<i64: 32, 128>}, {pipeline_mode = #tpu.pipeline_mode<synchronous>, transform_indices = @transform_5, window_bounds = array<i64: 1, 128>}, {pipeline_mode = #tpu.pipeline_mode<synchronous>, transform_indices = @transform_6, window_bounds = array<i64: 4, 128>}]} {
    %c0 = arith.constant 0 : index
    %c0_0 = arith.constant 0 : index
    %0 = vector.load %arg1[%c0, %c0_0] : memref<32x32xf32, #tpu.memory_space<vmem>>, vector<32x32xf32>
    %c0_1 = arith.constant 0 : index
    %c0_2 = arith.constant 0 : index
    %1 = vector.load %arg2[%c0_1, %c0_2] : memref<32x32xf32, #tpu.memory_space<vmem>>, vector<32x32xf32>
    %cst = arith.constant dense<0.000000e+00> : vector<32x32xf32>
    %2 = tpu.matmul %0, %1, %cst {dimension_numbers = #tpu.dot_dimension_numbers<[1], [0], [0], [1], [0, 0, 1, 1], [], []>} : vector<32x32xf32>, vector<32x32xf32>, vector<32x32xf32> -> vector<32x32xf32>
    %c0_3 = arith.constant 0 : index
    %c0_4 = arith.constant 0 : index
    %3 = vector.load %arg4[%c0_3, %c0_4] : memref<1x32xf32, #tpu.memory_space<vmem>>, vector<1x32xf32>
    %4 = vector.broadcast %3 : vector<1x32xf32> to vector<32x32xf32>
    %5 = arith.addf %2, %4 : vector<32x32xf32>
    %c0_5 = arith.constant 0 : index
    %c0_6 = arith.constant 0 : index
    %6 = vector.load %arg3[%c0_5, %c0_6] : memref<32x32xf32, #tpu.memory_space<vmem>>, vector<32x32xf32>
    %cst_7 = arith.constant 0.000000e+00 : f32
    %7 = vector.broadcast %cst_7 : f32 to vector<4x32xf32>
    %8 = vector.extract_strided_slice %5 {offsets = [0, 0], sizes = [4, 32], strides = [1, 1]} : vector<32x32xf32> to vector<4x32xf32>
    %cst_8 = arith.constant dense<0.000000e+00> : vector<4x32xf32>
    %9 = tpu.matmul %7, %6, %cst_8 {dimension_numbers = #tpu.dot_dimension_numbers<[1], [0], [0], [1], [0, 0, 1, 1], [], []>} : vector<4x32xf32>, vector<32x32xf32>, vector<4x32xf32> -> vector<4x32xf32>
    %10 = arith.addf %8, %9 : vector<4x32xf32>
    %11 = math.tanh %10 : vector<4x32xf32>
    %12 = vector.extract_strided_slice %5 {offsets = [4, 0], sizes = [4, 32], strides = [1, 1]} : vector<32x32xf32> to vector<4x32xf32>
    %cst_9 = arith.constant dense<0.000000e+00> : vector<4x32xf32>
    %13 = tpu.matmul %11, %6, %cst_9 {dimension_numbers = #tpu.dot_dimension_numbers<[1], [0], [0], [1], [0, 0, 1, 1], [], []>} : vector<4x32xf32>, vector<32x32xf32>, vector<4x32xf32> -> vector<4x32xf32>
    %14 = arith.addf %12, %13 : vector<4x32xf32>
    %15 = math.tanh %14 : vector<4x32xf32>
    %16 = vector.extract_strided_slice %5 {offsets = [8, 0], sizes = [4, 32], strides = [1, 1]} : vector<32x32xf32> to vector<4x32xf32>
    %cst_10 = arith.constant dense<0.000000e+00> : vector<4x32xf32>
    %17 = tpu.matmul %15, %6, %cst_10 {dimension_numbers = #tpu.dot_dimension_numbers<[1], [0], [0], [1], [0, 0, 1, 1], [], []>} : vector<4x32xf32>, vector<32x32xf32>, vector<4x32xf32> -> vector<4x32xf32>
    %18 = arith.addf %16, %17 : vector<4x32xf32>
    %19 = math.tanh %18 : vector<4x32xf32>
    %20 = vector.extract_strided_slice %5 {offsets = [12, 0], sizes = [4, 32], strides = [1, 1]} : vector<32x32xf32> to vector<4x32xf32>
    %cst_11 = arith.constant dense<0.000000e+00> : vector<4x32xf32>
    %21 = tpu.matmul %19, %6, %cst_11 {dimension_numbers = #tpu.dot_dimension_numbers<[1], [0], [0], [1], [0, 0, 1, 1], [], []>} : vector<4x32xf32>, vector<32x32xf32>, vector<4x32xf32> -> vector<4x32xf32>
    %22 = arith.addf %20, %21 : vector<4x32xf32>
    %23 = math.tanh %22 : vector<4x32xf32>
    %24 = vector.extract_strided_slice %5 {offsets = [16, 0], sizes = [4, 32], strides = [1, 1]} : vector<32x32xf32> to vector<4x32xf32>
    %cst_12 = arith.constant dense<0.000000e+00> : vector<4x32xf32>
    %25 = tpu.matmul %23, %6, %cst_12 {dimension_numbers = #tpu.dot_dimension_numbers<[1], [0], [0], [1], [0, 0, 1, 1], [], []>} : vector<4x32xf32>, vector<32x32xf32>, vector<4x32xf32> -> vector<4x32xf32>
    %26 = arith.addf %24, %25 : vector<4x32xf32>
    %27 = math.tanh %26 : vector<4x32xf32>
    %28 = vector.extract_strided_slice %5 {offsets = [20, 0], sizes = [4, 32], strides = [1, 1]} : vector<32x32xf32> to vector<4x32xf32>
    %cst_13 = arith.constant dense<0.000000e+00> : vector<4x32xf32>
    %29 = tpu.matmul %27, %6, %cst_13 {dimension_numbers = #tpu.dot_dimension_numbers<[1], [0], [0], [1], [0, 0, 1, 1], [], []>} : vector<4x32xf32>, vector<32x32xf32>, vector<4x32xf32> -> vector<4x32xf32>
    %30 = arith.addf %28, %29 : vector<4x32xf32>
    %31 = math.tanh %30 : vector<4x32xf32>
    %32 = vector.extract_strided_slice %5 {offsets = [24, 0], sizes = [4, 32], strides = [1, 1]} : vector<32x32xf32> to vector<4x32xf32>
    %cst_14 = arith.constant dense<0.000000e+00> : vector<4x32xf32>
    %33 = tpu.matmul %31, %6, %cst_14 {dimension_numbers = #tpu.dot_dimension_numbers<[1], [0], [0], [1], [0, 0, 1, 1], [], []>} : vector<4x32xf32>, vector<32x32xf32>, vector<4x32xf32> -> vector<4x32xf32>
    %34 = arith.addf %32, %33 : vector<4x32xf32>
    %35 = math.tanh %34 : vector<4x32xf32>
    %36 = vector.extract_strided_slice %5 {offsets = [28, 0], sizes = [4, 32], strides = [1, 1]} : vector<32x32xf32> to vector<4x32xf32>
    %cst_15 = arith.constant dense<0.000000e+00> : vector<4x32xf32>
    %37 = tpu.matmul %35, %6, %cst_15 {dimension_numbers = #tpu.dot_dimension_numbers<[1], [0], [0], [1], [0, 0, 1, 1], [], []>} : vector<4x32xf32>, vector<32x32xf32>, vector<4x32xf32> -> vector<4x32xf32>
    %38 = arith.addf %36, %37 : vector<4x32xf32>
    %39 = math.tanh %38 : vector<4x32xf32>
    %c0_16 = arith.constant 0 : index
    %c0_17 = arith.constant 0 : index
    %40 = vector.load %arg5[%c0_16, %c0_17] : memref<32x128xf32, #tpu.memory_space<vmem>>, vector<32x128xf32>
    %cst_18 = arith.constant dense<0.000000e+00> : vector<4x128xf32>
    %41 = tpu.matmul %39, %40, %cst_18 {dimension_numbers = #tpu.dot_dimension_numbers<[1], [0], [0], [1], [0, 0, 1, 1], [], []>} : vector<4x32xf32>, vector<32x128xf32>, vector<4x128xf32> -> vector<4x128xf32>
    %c0_19 = arith.constant 0 : index
    %c0_20 = arith.constant 0 : index
    %42 = vector.load %arg6[%c0_19, %c0_20] : memref<1x128xf32, #tpu.memory_space<vmem>>, vector<1x128xf32>
    %43 = vector.broadcast %42 : vector<1x128xf32> to vector<4x128xf32>
    %44 = arith.addf %41, %43 : vector<4x128xf32>
    %c0_21 = arith.constant 0 : index
    %c0_22 = arith.constant 0 : index
    %45 = vector.load %arg7[%c0_21, %c0_22] : memref<4x128xf32, #tpu.memory_space<vmem>>, vector<4x128xf32>
    tpu.vector_store %arg7[%c0_21, %c0_22], %44 {strides = array<i32>} : memref<4x128xf32, #tpu.memory_space<vmem>>, vector<4x128xf32>,
    return
  }
  func.func @transform_0(%arg0: i32) -> (i32, i32) {
    %c0_i32 = arith.constant 0 : i32
    %c0_i32_0 = arith.constant 0 : i32
    %c0_i32_1 = arith.constant 0 : i32
    return %c0_i32, %c0_i32_0 : i32, i32
  }
  func.func @transform_1(%arg0: i32) -> (i32, i32) {
    %c0_i32 = arith.constant 0 : i32
    %c0_i32_0 = arith.constant 0 : i32
    %c0_i32_1 = arith.constant 0 : i32
    return %c0_i32, %c0_i32_0 : i32, i32
  }
  func.func @transform_2(%arg0: i32) -> (i32, i32) {
    %c0_i32 = arith.constant 0 : i32
    %c0_i32_0 = arith.constant 0 : i32
    %c0_i32_1 = arith.constant 0 : i32
    return %c0_i32, %c0_i32_0 : i32, i32
  }
  func.func @transform_3(%arg0: i32) -> (i32, i32) {
    %c0_i32 = arith.constant 0 : i32
    %c0_i32_0 = arith.constant 0 : i32
    %c0_i32_1 = arith.constant 0 : i32
    return %c0_i32, %c0_i32_0 : i32, i32
  }
  func.func @transform_4(%arg0: i32) -> (i32, i32) {
    %c0_i32 = arith.constant 0 : i32
    %c0_i32_0 = arith.constant 0 : i32
    %c0_i32_1 = arith.constant 0 : i32
    return %c0_i32, %c0_i32_0 : i32, i32
  }
  func.func @transform_5(%arg0: i32) -> (i32, i32) {
    %c0_i32 = arith.constant 0 : i32
    %c0_i32_0 = arith.constant 0 : i32
    %c0_i32_1 = arith.constant 0 : i32
    return %c0_i32, %c0_i32_0 : i32, i32
  }
  func.func @transform_6(%arg0: i32) -> (i32, i32) {
    %c0_i32 = arith.constant 0 : i32
    %c0_i32_0 = arith.constant 0 : i32
    %c0_i32_1 = arith.constant 0 : i32
    return %c0_i32, %c0_i32_0 : i32, i32
  }
}

</mosaic_0001>

<bundles_post_ra>
// kernel: tpu_custom_call.1
= control target key start
LH: loop header
LB: loop body
LE: loop exit
PB: predicated region body
PF: predicated region fallthrough
CT: control target
= control target key end

     0   :  { %11 = vsyncpa [#allocation3], 0  ;;  %s1420_s0 = inlined_call_operand.hbm [shape: f32[32,32], index: 0, kind: input, shape index: {}]   ;;  %s1421_s1 = inlined_call_operand.hbm [shape: f32[32,32], index: 1, kind: input, shape index: {}]   ;;  %s1422_s2 = inlined_call_operand.hbm [shape: f32[32,32], index: 2, kind: input, shape index: {}]   ;;  %s1423_s3 = inlined_call_operand.vmem [shape: f32[1,32], index: 3, kind: input, shape index: {}]   ;;  %s1424_s4 = inlined_call_operand.hbm [shape: f32[32,128], index: 4, kind: input, shape index: {}]   ;;  %s1425_s5 = inlined_call_operand.vmem [shape: f32[1,128], index: 5, kind: input, shape index: {}]   ;;  %s1426_s6 = inlined_call_operand.hbm [shape: f32[4,128], index: 6, kind: output, shape index: {}]  }
   0x1   :  { %12 = vsyncpa [#allocation6], 0 }
   0x2   :  { %13 = vsyncpa [#allocation9], 0 }
   0x3   :  { %14 = vsyncpa [#allocation4], 0  ;;  %s1227_s21 = smov [#allocation5]   ;;  %s1228_s23 = smov [#allocation2]  }
   0x4   :  { %s32_s22 = sshll.u32 %s1227_s21, 4  ;;  %s20_s24 = sshll.u32 %s1228_s23, 4  ;;  %s33_s22 = int_to_ptr.vmem [resolvable:$true] %s32_s22  ;;  %s21_s24 = int_to_ptr.vmem [resolvable:$true] %s20_s24 }
   0x5   :  { %s1127_s25 = scalar_lea.vmem %s33_s22, 512  ;;  %p1132_p1 = scmp.lt.s32.totalorder %s33_s22, %s33_s22 }
   0x6   :  { %p1128_p0 = scmp.ne.s32.totalorder %s33_s22, %s1127_s25  ;;  %p1133_p2 = scmp.lt.s32.totalorder %s1127_s25, %s1127_s25 }
   0x8   :  { %p1134_p3 = por %p1133_p2, %p1132_p1 }
   0xa   :  { %p1135_p4 = pnand %p1134_p3, %p1128_p0 }
   0xc   :  { %1138 = shalt.err (!%p1135_p4)
}
   0xd   :  { %s1229_s26 = smov 128   ;;  %s1230_s27 = smov 8  }
   0xe   :  { %38 = dma.hbm_to_vmem [thread:$0]  %s1421_s1, 512, %s33_s22, [#allocation6], %s1229_s26, %s1229_s26, %s1230_s27  }
   0xf   :  { %s1147_s30 = scalar_lea.vmem %s21_s24, 512  ;;  %p1152_p6 = scmp.lt.s32.totalorder %s21_s24, %s21_s24 }
  0x10   :  { %p1148_p5 = scmp.ne.s32.totalorder %s21_s24, %s1147_s30  ;;  %p1153_p7 = scmp.lt.s32.totalorder %s1147_s30, %s1147_s30 }
  0x12   :  { %p1154_p8 = por %p1153_p7, %p1152_p6 }
  0x14   :  { %p1155_p9 = pnand %p1154_p8, %p1148_p5 }
  0x16   :  { %1158 = shalt.err (!%p1155_p9)
}
  0x17   :  { %26 = dma.hbm_to_vmem [thread:$0]  %s1420_s0, 512, %s21_s24, [#allocation3], %s1229_s26, %s1229_s26, %s1230_s27  }
  0x18   :  { %s1231_s9 = smov [#allocation7]   ;;  %s1232_s11 = smov [#allocation8]  }
  0x19   :  { %s44_s10 = sshll.u32 %s1231_s9, 4  ;;  %s58_s12 = sshll.u32 %s1232_s11, 4  ;;  %s45_s10 = int_to_ptr.vmem [resolvable:$true] %s44_s10  ;;  %s59_s12 = int_to_ptr.vmem [resolvable:$true] %s58_s12 }
  0x1a   :  { %s1167_s1 = scalar_lea.vmem %s45_s10, 512  ;;  %p1172_p11 = scmp.lt.s32.totalorder %s45_s10, %s45_s10 }
  0x1b   :  { %p1168_p10 = scmp.ne.s32.totalorder %s45_s10, %s1167_s1  ;;  %p1173_p12 = scmp.lt.s32.totalorder %s1167_s1, %s1167_s1 }
  0x1d   :  { %p1174_p13 = por %p1173_p12, %p1172_p11 }
  0x1f   :  { %p1175_p0 = pnand %p1174_p13, %p1168_p10 }
  0x21   :  { %1178 = shalt.err (!%p1175_p0)
}
  0x22   :  { %50 = dma.hbm_to_vmem [thread:$0]  %s1422_s2, 512, %s45_s10, [#allocation6], %s1229_s26, %s1229_s26, %s1230_s27  }
  0x23   :  { %s1187_s0 = scalar_lea.vmem %s59_s12, 512  ;;  %p1192_p2 = scmp.lt.s32.totalorder %s59_s12, %s59_s12 }
  0x24   :  { %p1188_p1 = scmp.ne.s32.totalorder %s59_s12, %s1187_s0  ;;  %p1193_p3 = scmp.lt.s32.totalorder %s1187_s0, %s1187_s0 }
  0x26   :  { %p1194_p4 = por %p1193_p3, %p1192_p2 }
  0x28   :  { %p1195_p5 = pnand %p1194_p4, %p1188_p1 }
  0x2a   :  { %1198 = shalt.err (!%p1195_p5)
}
  0x2b   :  { %64 = dma.hbm_to_vmem [thread:$0]  %s1424_s4, 512, %s59_s12, [#allocation9], %s1229_s26, %s1229_s26, %s1230_s27  }
  0x2c   :  { %1219 = dma.done.wait [#allocation3], 512  }
  0x2d   :  { %1220 = vsyncadd [#allocation3], 4294966784 }
  0x2e   :  { %1221 = dma.done.wait [#allocation6], 1024  }
  0x2f   :  { %1222 = vsyncadd [#allocation6], 4294966272 }
  0x30   :  { %1223 = dma.done.wait [#allocation9], 512  }
  0x31   :  { %1224 = vsyncadd [#allocation9], 4294966784  ;;  %v1233_v0 = vmov 0.0   ;;  %vm1234_vm0 = vmmov 0   ;;  %v86_v1 = vld [vmem:[#allocation5 + $0x18] sm:$0xff]  ;;  %v85_v2 = vld [vmem:[#allocation5 + $0x10] sm:$0xff] }
  0x32   :  { %995 = vmatprep.subr.mxu1 %v1233_v0  ;;  %1003 = vmatprep.mubr.msk.f32.mxu1 %vm1234_vm0, %v1233_v0  ;;  %v1298_v3 = vld [vmem:[#allocation7 + $0x18] sm:$0xff]  ;;  %v1301_v4 = vld [vmem:[#allocation7 + $0x10] sm:$0xff]  ;;  %v84_v5 = vld [vmem:[#allocation5 + $0x8] sm:$0xff]  ;;  %vm94_vm1 = vcmask 261120   ;;  %s1235_s18 = smov [#allocation10]  }
  0x33   :  { %981 = vmatprep.subr.mxu0 %v86_v1  ;;  %996 = vmatpush3.msra.mxu1 %v1298_v3  ;;  %v79_v6 = vld [vmem:[#allocation2] sm:$0xff]  ;;  %v1305_v7 = vld [vmem:[#allocation7 + $0x8] sm:$0xff]  ;;  %v81_v11 = vld [vmem:[#allocation2 + $0x10] sm:$0xff]  ;;  %s903_s19 = sshll.u32 %s1235_s18, 4  ;;  %s904_s19 = int_to_ptr.vmem [resolvable:$true] %s903_s19 }
  0x34   :  { %982 = vmatpush3.msra.mxu0 %v86_v1  ;;  %997 = vmatprep.subr.mxu1 %v1233_v0  ;;  %v83_v8 = vld [vmem:[#allocation5] sm:$0xff]  ;;  %v80_v10 = vld [vmem:[#allocation2 + $0x8] sm:$0xff]  ;;  %v82_v12 = vld [vmem:[#allocation2 + $0x18] sm:$0xff]  ;;  %s1199_s20 = scalar_lea.vmem %s904_s19, 64  ;;  %p1204_p7 = scmp.lt.s32.totalorder %s904_s19, %s904_s19 }
  0x35   :  { %983 = vmatprep.subr.mxu0 %v85_v2  ;;  %998 = vmatpush3.msra.mxu1 %v1301_v4  ;;  %v1309_v9 = vld [vmem:[#allocation7] sm:$0xff]  ;;  %v814_v56 = vld [vmem:[#allocation8 + $0x18] sm:$0xff]  ;;  %v813_v57 = vld [vmem:[#allocation8 + $0x10] sm:$0xff]  ;;  %p1200_p6 = scmp.ne.s32.totalorder %s904_s19, %s1199_s20  ;;  %p1205_p8 = scmp.lt.s32.totalorder %s1199_s20, %s1199_s20 }
  0x36   :  { %984 = vmatpush3.msra.mxu0 %v85_v2  ;;  %999 = vmatprep.subr.mxu1 %v1233_v0  ;;  %v1343_v15 = vld [vmem:[%s1423_s3] ss:$0 sm:$0xff]  ;;  %v812_v58 = vld [vmem:[#allocation8 + $0x8] sm:$0xff] }
  0x37   :  { %985 = vmatprep.subr.mxu0 %v84_v5  ;;  %989 = vmatprep.mubr.msk.f32.mxu0 %vm94_vm1, %v79_v6  ;;  %v811_v59 = vld [vmem:[#allocation8] sm:$0xff]  ;;  %p1206_p9 = por %p1205_p8, %p1204_p7 }
  0x38   :  { %986 = vmatpush3.msra.mxu0 %v84_v5  ;;  %1000 = vmatpush3.msra.mxu1 %v1305_v7 }
  0x39   :  { %987 = vmatprep.subr.mxu0 %v83_v8  ;;  %1001 = vmatprep.subr.mxu1 %v1233_v0  ;;  %p1207_p10 = pnand %p1206_p9, %p1200_p6 }
  0x3a   :  { %988 = vmatpush3.msra.mxu0 %v83_v8  ;;  %1002 = vmatpush3.msra.mxu1 %v1309_v9 }
  0x3b   :  { %990 = vmatmul.mubr.msk.f32.vlgmr.msra.gmra.mxu0 %vm94_vm1, %v80_v10  ;;  %1004 = vmatmul.mubr.f32.vlgmr.msra.gmra.mxu1 %v1233_v0 }
  0x3c   :  { %1006 = vmatprep.subr.mxu0 %v1233_v0  ;;  %1017 = vmatprep.subr.mxu1 %v1233_v0 }
  0x3d   :  { %1007 = vmatpush3.msra.mxu0 %v1298_v3  ;;  %1018 = vmatpush3.msra.mxu1 %v1298_v3 }
  0x3e   :  { %1008 = vmatprep.subr.mxu0 %v1233_v0  ;;  %1019 = vmatprep.subr.mxu1 %v1233_v0 }
  0x3f   :  { %1009 = vmatpush3.msra.mxu0 %v1301_v4  ;;  %1020 = vmatpush3.msra.mxu1 %v1301_v4 }
  0x40   :  { %1010 = vmatprep.subr.mxu0 %v1233_v0  ;;  %1021 = vmatprep.subr.mxu1 %v1233_v0 }
  0x41   :  { %1011 = vmatpush3.msra.mxu0 %v1305_v7  ;;  %1022 = vmatpush3.msra.mxu1 %v1305_v7 }
  0x42   :  { %1012 = vmatprep.subr.mxu0 %v1233_v0  ;;  %1023 = vmatprep.subr.mxu1 %v1233_v0 }
  0x43   :  { %1013 = vmatpush3.msra.mxu0 %v1309_v9  ;;  %1024 = vmatpush3.msra.mxu1 %v1309_v9 }
  0x44   :  { %1025 = vmatprep.mubr.msk.f32.mxu1 %vm1234_vm0, %v1233_v0  ;;  %1028 = vmatprep.subr.mxu0 %v1233_v0 }
  0x45   :  { %1039 = vmatprep.subr.mxu1 %v1233_v0  ;;  %992 = vmatprep.mubr.msk.f32.mxu0 %vm94_vm1, %v81_v11 }
  0x46   :  { %993 = vmatmul.mubr.msk.f32.gmra.mxu0 %vm94_vm1, %v82_v12 }
  0x47   :  { %1014 = vmatprep.mubr.msk.f32.mxu0 %vm1234_vm0, %v1233_v0 }
  0xfb   :  { %v991_v13 = vpop.f32.mrf.mxu0  ;;  %v265_v14 = vpop.f32.mrf.mxu1 }
  0xfc   :  { %v179_v29 = vadd.f32 %v991_v13, %v1343_v15 }
  0xfd   :  { %v173_v16 = vpop.f32.mrf.mxu0  ;;  %v1005_v17 = vpop.f32.mrf.mxu1 }
  0xfe   :  { %v174_v18 = vadd.f32 %v1343_v15, %v173_v16 }
 0x100   :  { %v269_v19 = vadd.f32 %v265_v14, %v174_v18 }
 0x102   :  { %1103 = vtanh.f32 %v269_v19 }
 0x106   :  { %v1357_v21 = vpop.f32.mrf.mxu0 }
 0x107   :  { %v189_v51 = vadd.f32 %v1357_v21, %v1343_v15 }
 0x108   :  { %v183_v22 = vpop.f32.mrf.mxu0 }
 0x109   :  { %v184_v40 = vadd.f32 %v1343_v15, %v183_v22 }
 0x10f   :  { %v1104_v20 = vpop.eup %1103 }
 0x110   :  { %1015 = vmatmul.mubr.msk.f32.vlgmr.msra.gmra.mxu0 %vm94_vm1, %v1104_v20 }
 0x111   :  { %1029 = vmatpush3.msra.mxu0 %v1298_v3  ;;  %1036 = vmatprep.mubr.msk.f32.mxu0 %vm1234_vm0, %v1233_v0 }
 0x112   :  { %1030 = vmatprep.subr.mxu0 %v1233_v0 }
 0x113   :  { %1031 = vmatpush3.msra.mxu0 %v1301_v4 }
 0x114   :  { %1032 = vmatprep.subr.mxu0 %v1233_v0 }
 0x115   :  { %1033 = vmatpush3.msra.mxu0 %v1305_v7 }
 0x116   :  { %1034 = vmatprep.subr.mxu0 %v1233_v0 }
 0x117   :  { %1035 = vmatpush3.msra.mxu0 %v1309_v9 }
 0x118   :  { %1050 = vmatprep.subr.mxu0 %v1233_v0 }
 0x1d0   :  { %v340_v23 = vpop.f32.mrf.mxu0 }
 0x1d1   :  { %v345_v24 = vrot.slane %v340_v23, 4 }
 0x1d2   :  { %v1016_v25 = vpop.f32.mrf.mxu0 }
 0x1d3   :  { %v347_v26 = vadd.f32 %v345_v24, %v174_v18 }
 0x1d5   :  { %1105 = vtanh.f32 %v347_v26 }
 0x1e2   :  { %v1106_v27 = vpop.eup %1105 }
 0x1e3   :  { %v350_v28 = vrot.slane %v1106_v27, 4 }
 0x1e5   :  { %1026 = vmatmul.mubr.msk.f32.vlgmr.msra.gmra.mxu1 %vm94_vm1, %v350_v28 }
 0x1e6   :  { %1040 = vmatpush3.msra.mxu1 %v1298_v3  ;;  %1047 = vmatprep.mubr.msk.f32.mxu1 %vm1234_vm0, %v1233_v0 }
 0x1e7   :  { %1041 = vmatprep.subr.mxu1 %v1233_v0 }
 0x1e8   :  { %1042 = vmatpush3.msra.mxu1 %v1301_v4 }
 0x1e9   :  { %1043 = vmatprep.subr.mxu1 %v1233_v0 }
 0x1ea   :  { %1044 = vmatpush3.msra.mxu1 %v1305_v7 }
 0x1eb   :  { %1045 = vmatprep.subr.mxu1 %v1233_v0 }
 0x1ec   :  { %1046 = vmatpush3.msra.mxu1 %v1309_v9 }
 0x1ed   :  { %1061 = vmatprep.subr.mxu1 %v1233_v0 }
 0x2a5   :  { %v419_v30 = vpop.f32.mrf.mxu1 }
 0x2a6   :  { %v423_v31 = vadd.f32 %v419_v30, %v179_v29 }
 0x2a7   :  { %v1027_v32 = vpop.f32.mrf.mxu1 }
 0x2a8   :  { %1107 = vtanh.f32 %v423_v31 }
 0x2b5   :  { %v1108_v33 = vpop.eup %1107 }
 0x2b6   :  { %1037 = vmatmul.mubr.msk.f32.vlgmr.msra.gmra.mxu0 %vm94_vm1, %v1108_v33 }
 0x2b7   :  { %1051 = vmatpush3.msra.mxu0 %v1298_v3  ;;  %1058 = vmatprep.mubr.msk.f32.mxu0 %vm1234_vm0, %v1233_v0 }
 0x2b8   :  { %1052 = vmatprep.subr.mxu0 %v1233_v0 }
 0x2b9   :  { %1053 = vmatpush3.msra.mxu0 %v1301_v4 }
 0x2ba   :  { %1054 = vmatprep.subr.mxu0 %v1233_v0 }
 0x2bb   :  { %1055 = vmatpush3.msra.mxu0 %v1305_v7 }
 0x2bc   :  { %1056 = vmatprep.subr.mxu0 %v1233_v0 }
 0x2bd   :  { %1057 = vmatpush3.msra.mxu0 %v1309_v9 }
 0x2be   :  { %1072 = vmatprep.subr.mxu0 %v1233_v0 }
 0x376   :  { %v494_v34 = vpop.f32.mrf.mxu0 }
 0x377   :  { %v499_v35 = vrot.slane %v494_v34, 4 }
 0x378   :  { %v1038_v36 = vpop.f32.mrf.mxu0 }
 0x379   :  { %v501_v37 = vadd.f32 %v499_v35, %v179_v29 }
 0x37b   :  { %1109 = vtanh.f32 %v501_v37 }
 0x388   :  { %v1110_v38 = vpop.eup %1109 }
 0x389   :  { %v504_v39 = vrot.slane %v1110_v38, 4 }
 0x38b   :  { %1048 = vmatmul.mubr.msk.f32.vlgmr.msra.gmra.mxu1 %vm94_vm1, %v504_v39 }
 0x38c   :  { %1062 = vmatpush3.msra.mxu1 %v1298_v3  ;;  %1069 = vmatprep.mubr.msk.f32.mxu1 %vm1234_vm0, %v1233_v0 }
 0x38d   :  { %1063 = vmatprep.subr.mxu1 %v1233_v0 }
 0x38e   :  { %1064 = vmatpush3.msra.mxu1 %v1301_v4 }
 0x38f   :  { %1065 = vmatprep.subr.mxu1 %v1233_v0 }
 0x390   :  { %1066 = vmatpush3.msra.mxu1 %v1305_v7 }
 0x391   :  { %1067 = vmatprep.subr.mxu1 %v1233_v0 }
 0x392   :  { %1068 = vmatpush3.msra.mxu1 %v1309_v9 }
 0x393   :  { %1083 = vmatprep.subr.mxu1 %v1233_v0 }
 0x44b   :  { %v573_v41 = vpop.f32.mrf.mxu1 }
 0x44c   :  { %v577_v42 = vadd.f32 %v573_v41, %v184_v40 }
 0x44d   :  { %v1049_v43 = vpop.f32.mrf.mxu1 }
 0x44e   :  { %1111 = vtanh.f32 %v577_v42 }
 0x45b   :  { %v1112_v44 = vpop.eup %1111 }
 0x45c   :  { %1059 = vmatmul.mubr.msk.f32.vlgmr.msra.gmra.mxu0 %vm94_vm1, %v1112_v44 }
 0x45d   :  { %1073 = vmatpush3.msra.mxu0 %v1298_v3  ;;  %1080 = vmatprep.mubr.msk.f32.mxu0 %vm1234_vm0, %v1233_v0  ;;  %v926_v3 = vld [vmem:[%s1425_s5] ss:$0 sm:$0xff] }
 0x45e   :  { %1074 = vmatprep.subr.mxu0 %v1233_v0 }
 0x45f   :  { %1075 = vmatpush3.msra.mxu0 %v1301_v4 }
 0x460   :  { %1076 = vmatprep.subr.mxu0 %v1233_v0 }
 0x461   :  { %1077 = vmatpush3.msra.mxu0 %v1305_v7 }
 0x462   :  { %1078 = vmatprep.subr.mxu0 %v1233_v0 }
 0x463   :  { %1079 = vmatpush3.msra.mxu0 %v1309_v9 }
 0x51c   :  { %v648_v45 = vpop.f32.mrf.mxu0 }
 0x51d   :  { %v653_v46 = vrot.slane %v648_v45, 4 }
 0x51e   :  { %v1060_v47 = vpop.f32.mrf.mxu0 }
 0x51f   :  { %v655_v48 = vadd.f32 %v653_v46, %v184_v40 }
 0x521   :  { %1113 = vtanh.f32 %v655_v48 }
 0x52e   :  { %v1114_v49 = vpop.eup %1113 }
 0x52f   :  { %v658_v50 = vrot.slane %v1114_v49, 4 }
 0x531   :  { %1070 = vmatmul.mubr.msk.f32.vlgmr.msra.gmra.mxu1 %vm94_vm1, %v658_v50 }
 0x532   :  { %1091 = vmatprep.mubr.msk.f32.mxu1 %vm1234_vm0, %v1233_v0  ;;  %1084 = vmatpush3.msra.mxu1 %v814_v56 }
 0x533   :  { %1085 = vmatprep.subr.mxu1 %v1233_v0 }
 0x534   :  { %1086 = vmatpush3.msra.mxu1 %v813_v57 }
 0x535   :  { %1087 = vmatprep.subr.mxu1 %v1233_v0 }
 0x536   :  { %1088 = vmatpush3.msra.mxu1 %v812_v58 }
 0x537   :  { %1089 = vmatprep.subr.mxu1 %v1233_v0 }
 0x538   :  { %1090 = vmatpush3.msra.mxu1 %v811_v59 }
 0x5f1   :  { %v727_v52 = vpop.f32.mrf.mxu1 }
 0x5f2   :  { %v731_v53 = vadd.f32 %v727_v52, %v189_v51 }
 0x5f3   :  { %v1071_v54 = vpop.f32.mrf.mxu1 }
 0x5f4   :  { %1115 = vtanh.f32 %v731_v53 }
 0x601   :  { %v1116_v55 = vpop.eup %1115 }
 0x602   :  { %1081 = vmatmul.mubr.msk.f32.vlgmr.msra.gmra.mxu0 %vm94_vm1, %v1116_v55 }
 0x6c2   :  { %v802_v60 = vpop.f32.mrf.mxu0 }
 0x6c3   :  { %v807_v61 = vrot.slane %v802_v60, 4 }
 0x6c4   :  { %v1082_v62 = vpop.f32.mrf.mxu0 }
 0x6c5   :  { %v809_v63 = vadd.f32 %v807_v61, %v189_v51 }
 0x6c7   :  { %1117 = vtanh.f32 %v809_v63 }
 0x6d4   :  { %v1118_v1 = vpop.eup %1117 }
 0x6d5   :  { %v823_v2 = vrot.slane %v1118_v1, 4 }
 0x6d7   :  { %1092 = vmatmul.mubr.msk.f32.vlgmr.msra.gmra.mxu1 %vm94_vm1, %v823_v2 }
 0x797   :  { %v892_v4 = vpop.f32.mrf.mxu1 }
 0x798   :  { %v893_v5 = vadd.f32 %v926_v3, %v892_v4 }
 0x799   :  { %v1093_v0 = vpop.f32.mrf.mxu1 }
 0x79a   :  { %896 = vst [vmem:[#allocation10] sm:$0xf] %v893_v5 }
 0x79b   :  { %1210 = shalt.err (!%p1207_p10)
}
 0x79c   :  { %906 = dma.vmem_to_hbm [thread:$0]  %s904_s19, 64, %s1426_s6, [#allocation4]  }
 0x79d   :  { %1225 = dma.done.wait [#allocation4], 64  }
 0x79e   :  { %1226 = vsyncadd [#allocation4], 4294967232 }
 0x79f   :  { %910 = vsyncpa [#allocation3], 1 }
 0x7a0   :  { %911 = vsyncpa [#allocation6], 1 }
 0x7a1   :  { %912 = vsyncpa [#allocation9], 1 }
 0x7a2   :  { %913 = vsyncpa [#allocation4], 1 }

</bundles_post_ra>
